<compile_context>
chip_gen: v7x
topology: tpu7x:2x2x1
jax: 0.10.0
libtpu: 0.0.40
codegen_flags: <defaults>
</compile_context>

<pallas_src>
import functools

import jax
import jax.numpy as jnp
import numpy as np
from jax import lax
from jax.experimental import pallas as pl
from jax.experimental.pallas import tpu as pltpu


def _sepconv_kernel(x_ref, top_ref, bot_ref, dw_ref, pw_ref, b_ref, o_ref,
                    ubuf, dbuf, *, th, w):
    """One (batch, row-tile) step.

    x_ref:   (1, Cin, TH*W)  row-tile, spatial flattened onto the lane axis
    top_ref: (1, 1, Cin, W)  image row directly above the tile (zeros at the border)
    bot_ref: (1, 1, Cin, W)  image row directly below the tile (zeros at the border)
    dw_ref:  (Cin, 9)        depthwise 3x3 weights, tap index = 3*ky + kx
    pw_ref:  (Cout, Cin)     pointwise 1x1 weights
    b_ref:   (Cout, 1)       effective bias  pw @ dw_bias + pw_bias
    o_ref:   (1, Cout, TH*W)
    ubuf/dbuf: (Cin, TH*W)   VMEM scratch used to splice the halo rows in
    """
    p = th * w
    x = x_ref[0]                       # (Cin, P)
    dw = dw_ref[...]                   # (Cin, 9)
    top = top_ref[0, 0]                # (Cin, W)
    bot = bot_ref[0, 0]                # (Cin, W)

    # Plane of pixels one row ABOVE each output pixel:
    #   roll the tile down by one row, then overwrite row 0 with the top halo.
    ubuf[...] = pltpu.roll(x, shift=w, axis=1)
    ubuf[:, 0:w] = top
    up = ubuf[...]

    # Plane of pixels one row BELOW each output pixel:
    #   splice the bottom halo into row 0's slot, then roll up by one row so the
    #   spliced row wraps around into the last row's position.
    dbuf[...] = x
    dbuf[:, 0:w] = bot
    down = pltpu.roll(dbuf[...], shift=p - w, axis=1)

    # Column masks implementing the left/right zero padding.
    lane = lax.broadcasted_iota(jnp.int32, (1, p), 1)
    col = lane % w
    left_ok = col >= 1           # tap reads column j-1
    right_ok = col <= w - 2      # tap reads column j+1

    # Depthwise 3x3: 9 shifted planes, per-channel broadcast MACs on the VPU,
    # accumulated in f32 (rolls run on the XLU, masks/selects on the VPU).
    acc = jnp.zeros(x.shape, jnp.float32)
    for ky, v in enumerate((up, x, down)):
        v_l = jnp.where(left_ok, pltpu.roll(v, shift=1, axis=1), 0)
        v_r = jnp.where(right_ok, pltpu.roll(v, shift=p - 1, axis=1), 0)
        acc = acc + v_l * dw[:, 3 * ky + 0:3 * ky + 1]
        acc = acc + v * dw[:, 3 * ky + 1:3 * ky + 2]
        acc = acc + v_r * dw[:, 3 * ky + 2:3 * ky + 3]

    # Pointwise 1x1: one MXU matmul with the wide (lane-dense) spatial axis as N.
    out = jnp.dot(pw_ref[...], acc, preferred_element_type=jnp.float32)
    out = out + b_ref[...]
    o_ref[0] = out.astype(o_ref.dtype)


def _choose_row_tile(h, w, cin, cout, itemsize, target_bytes=2 << 20):
    """Largest divisor of H whose row-tile is lane-dense and fits a VMEM budget."""
    cands = [d for d in range(1, h + 1) if h % d == 0 and (d * w) % 128 == 0]
    if not cands:
        return h                      # full-image block is always a legal BlockSpec
    per_row = w * max(cin, cout) * itemsize
    fitting = [d for d in cands if d * per_row <= target_bytes]
    return max(fitting) if fitting else min(cands)


def separable_conv2d(x, dw_weight, dw_bias, pw_weight, pw_bias,
                     *, kernel_size=3, padding=1, row_tile=None):
    """Pallas TPU forward pass of SeparableConv2d (NCHW in, NCHW out).

    x:         (N, Cin, H, W)
    dw_weight: (Cin, 1, 3, 3)   depthwise conv weight (PyTorch layout)
    dw_bias:   (Cin,)
    pw_weight: (Cout, Cin, 1, 1)
    pw_bias:   (Cout,)
    returns:   (N, Cout, H, W)
    """
    if kernel_size != 3 or padding != 1:
        # TODO(synk): generalize the in-kernel halo depth for kernel_size != 3.
        raise NotImplementedError("only the 3x3 / padding=1 MobileNet config is implemented")

    n, cin, h, w = x.shape
    cout = pw_weight.shape[0]
    itemsize = jnp.dtype(x.dtype).itemsize

    th = row_tile if row_tile is not None else _choose_row_tile(h, w, cin, cout, itemsize)
    assert h % th == 0, "row_tile must divide H"
    assert (th * w) % 128 == 0 or th == h, "row tile must be lane-dense or cover the full image"
    n_t = h // th
    p = th * w

    # ---- layout glue (cheap: reshapes are free, halo slices touch 2 rows per tile) ----
    x_flat = x.reshape(n, cin, h * w)
    x5 = x.reshape(n, cin, n_t, th, w)
    zero_row = jnp.zeros((n, cin, 1, w), x.dtype)
    # halo above tile t = last row of tile t-1 ; halo below tile t = first row of tile t+1
    top_halo = jnp.concatenate([zero_row, x5[:, :, :-1, th - 1, :]], axis=2)
    bot_halo = jnp.concatenate([x5[:, :, 1:, 0, :], zero_row], axis=2)
    top_halo = jnp.transpose(top_halo, (0, 2, 1, 3))       # (N, n_t, Cin, W)
    bot_halo = jnp.transpose(bot_halo, (0, 2, 1, 3))       # (N, n_t, Cin, W)

    dw_f = dw_weight.reshape(cin, kernel_size * kernel_size).astype(x.dtype)   # (Cin, 9)
    pw_m = pw_weight[:, :, 0, 0].astype(x.dtype)                               # (Cout, Cin)
    b_eff = (jnp.dot(pw_weight[:, :, 0, 0].astype(jnp.float32),
                     dw_bias.astype(jnp.float32))
             + pw_bias.astype(jnp.float32)).reshape(cout, 1)                   # (Cout, 1)

    kernel = functools.partial(_sepconv_kernel, th=th, w=w)

    # Rough per-step VMEM need (double-buffered IO blocks + scratch + temporaries).
    est = (2 * cin * p + 2 * cout * p + 4 * cin * w) * itemsize
    est += 2 * cin * p * itemsize + (10 * cin + 2 * cout) * p * 4
    vmem_limit = int(min(max(2 * est, 32 * 1024 * 1024), 64 * 1024 * 1024))

    out_flat = pl.pallas_call(
        kernel,
        out_shape=jax.ShapeDtypeStruct((n, cout, h * w), x.dtype),
        grid_spec=pltpu.PrefetchScalarGridSpec(
            num_scalar_prefetch=0,
            grid=(n, n_t),
            in_specs=[
                pl.BlockSpec((1, cin, p), lambda b, t: (b, 0, t)),
                pl.BlockSpec((1, 1, cin, w), lambda b, t: (b, t, 0, 0)),
                pl.BlockSpec((1, 1, cin, w), lambda b, t: (b, t, 0, 0)),
                pl.BlockSpec((cin, kernel_size * kernel_size), lambda b, t: (0, 0)),
                pl.BlockSpec((cout, cin), lambda b, t: (0, 0)),
                pl.BlockSpec((cout, 1), lambda b, t: (0, 0)),
            ],
            out_specs=pl.BlockSpec((1, cout, p), lambda b, t: (b, 0, t)),
            scratch_shapes=[pltpu.VMEM((cin, p), x.dtype),
                            pltpu.VMEM((cin, p), x.dtype)],
        ),
        compiler_params=pltpu.CompilerParams(
            dimension_semantics=("parallel", "parallel"),
            vmem_limit_bytes=vmem_limit),
    )(x_flat, top_halo, bot_halo, dw_f, pw_m, b_eff)

    return out_flat.reshape(n, cout, h, w)


def _reference(x, dw_weight, dw_bias, pw_weight, pw_bias, padding=1):
    """Pure-JAX reference (matches PyTorch nn.Conv2d semantics)."""
    cin = x.shape[1]
    dw = lax.conv_general_dilated(
        x, dw_weight, window_strides=(1, 1),
        padding=((padding, padding), (padding, padding)),
        feature_group_count=cin,
        dimension_numbers=("NCHW", "OIHW", "NCHW"))
    dw = dw + dw_bias.reshape(1, -1, 1, 1)
    pw = lax.conv_general_dilated(
        dw, pw_weight, window_strides=(1, 1), padding="VALID",
        dimension_numbers=("NCHW", "OIHW", "NCHW"))
    return pw + pw_bias.reshape(1, -1, 1, 1)


if __name__ == "__main__":
    key = jax.random.PRNGKey(0)
    k_x, k_dw, k_dwb, k_pw, k_pwb = jax.random.split(key, 5)

    N, Cin, Cout, H, W, K = 2, 4, 8, 16, 16, 3

    x = jax.random.normal(k_x, (N, Cin, H, W), dtype=jnp.float32)
    dw_weight = jax.random.normal(k_dw, (Cin, 1, K, K), dtype=jnp.float32) * 0.1
    dw_bias = jax.random.normal(k_dwb, (Cin,), dtype=jnp.float32) * 0.1
    pw_weight = jax.random.normal(k_pw, (Cout, Cin, 1, 1), dtype=jnp.float32) * 0.1
    pw_bias = jax.random.normal(k_pwb, (Cout,), dtype=jnp.float32) * 0.1

    # row_tile=8 -> lane width TH*W = 128 (fully lane-dense) and a (2, 2) grid,
    # which also exercises the interior-halo path across row tiles.
    out = separable_conv2d(x, dw_weight, dw_bias, pw_weight, pw_bias,
                           kernel_size=K, padding=1, row_tile=8)
    out = jax.block_until_ready(out)

    ref = _reference(x, dw_weight, dw_bias, pw_weight, pw_bias, padding=1)
    np.testing.assert_allclose(np.asarray(out), np.asarray(ref),
                               rtol=1e-5, atol=1e-5)
    assert out.shape == (N, Cout, H, W)
    print("KERNEL_OK")
</pallas_src>

<mosaic_0001>
module attributes {stable_mosaic.version = 11 : i64} {
  func.func @_sepconv_kernel(%arg0: i32, %arg1: i32, %arg2: memref<1x4x128xf32, #tpu.memory_space<vmem>>, %arg3: memref<1x1x4x16xf32, #tpu.memory_space<vmem>>, %arg4: memref<1x1x4x16xf32, #tpu.memory_space<vmem>>, %arg5: memref<4x9xf32, #tpu.memory_space<vmem>>, %arg6: memref<8x4xf32, #tpu.memory_space<vmem>>, %arg7: memref<8x1xf32, #tpu.memory_space<vmem>>, %arg8: memref<1x8x128xf32, #tpu.memory_space<vmem>>, %arg9: memref<4x128xf32, #tpu.memory_space<vmem>>, %arg10: memref<4x128xf32, #tpu.memory_space<vmem>>) attributes {dimension_semantics = [#tpu.dimension_semantics<parallel>, #tpu.dimension_semantics<parallel>], iteration_bounds = array<i64: 2, 2>, scalar_prefetch = 0 : i64, scratch_operands = 2 : i64, tpu.core_type = #tpu.core_type<tc>, window_params = [{transform_indices = @transform_0, window_bounds = array<i64: 1, 4, 128>}, {transform_indices = @transform_1, window_bounds = array<i64: 1, 1, 4, 16>}, {transform_indices = @transform_2, window_bounds = array<i64: 1, 1, 4, 16>}, {pipeline_mode = #tpu.pipeline_mode<synchronous>, transform_indices = @transform_3, window_bounds = array<i64: 4, 9>}, {pipeline_mode = #tpu.pipeline_mode<synchronous>, transform_indices = @transform_4, window_bounds = array<i64: 8, 4>}, {pipeline_mode = #tpu.pipeline_mode<synchronous>, transform_indices = @transform_5, window_bounds = array<i64: 8, 1>}, {transform_indices = @transform_6, window_bounds = array<i64: 1, 8, 128>}]} {
    %c0 = arith.constant 0 : index
    %c0_0 = arith.constant 0 : index
    %c0_1 = arith.constant 0 : index
    %0 = vector.load %arg2[%c0, %c0_0, %c0_1] : memref<1x4x128xf32, #tpu.memory_space<vmem>>, vector<1x4x128xf32>
    %1 = vector.shape_cast %0 : vector<1x4x128xf32> to vector<4x128xf32>
    %c0_2 = arith.constant 0 : index
    %c0_3 = arith.constant 0 : index
    %2 = vector.load %arg5[%c0_2, %c0_3] : memref<4x9xf32, #tpu.memory_space<vmem>>, vector<4x9xf32>
    %c0_4 = arith.constant 0 : index
    %c0_5 = arith.constant 0 : index
    %c0_6 = arith.constant 0 : index
    %c0_7 = arith.constant 0 : index
    %3 = vector.load %arg3[%c0_4, %c0_5, %c0_6, %c0_7] : memref<1x1x4x16xf32, #tpu.memory_space<vmem>>, vector<1x1x4x16xf32>
    %4 = vector.shape_cast %3 : vector<1x1x4x16xf32> to vector<4x16xf32>
    %c0_8 = arith.constant 0 : index
    %c0_9 = arith.constant 0 : index
    %c0_10 = arith.constant 0 : index
    %c0_11 = arith.constant 0 : index
    %5 = vector.load %arg4[%c0_8, %c0_9, %c0_10, %c0_11] : memref<1x1x4x16xf32, #tpu.memory_space<vmem>>, vector<1x1x4x16xf32>
    %6 = vector.shape_cast %5 : vector<1x1x4x16xf32> to vector<4x16xf32>
    %c16_i32 = arith.constant 16 : i32
    %7 = tpu.dynamic_rotate %1 by %c16_i32 dim 1 : vector<4x128xf32>, i32 -> vector<4x128xf32>
    %c0_12 = arith.constant 0 : index
    %c0_13 = arith.constant 0 : index
    %8 = vector.load %arg9[%c0_12, %c0_13] : memref<4x128xf32, #tpu.memory_space<vmem>>, vector<4x128xf32>
    tpu.vector_store %arg9[%c0_12, %c0_13], %7 {strides = array<i32>} : memref<4x128xf32, #tpu.memory_space<vmem>>, vector<4x128xf32>,
    %c0_14 = arith.constant 0 : index
    %c0_15 = arith.constant 0 : index
    %9 = vector.load %arg9[%c0_14, %c0_15] : memref<4x128xf32, #tpu.memory_space<vmem>>, vector<4x16xf32>
    tpu.vector_store %arg9[%c0_14, %c0_15], %4 {strides = array<i32>} : memref<4x128xf32, #tpu.memory_space<vmem>>, vector<4x16xf32>,
    %c0_16 = arith.constant 0 : index
    %c0_17 = arith.constant 0 : index
    %10 = vector.load %arg9[%c0_16, %c0_17] : memref<4x128xf32, #tpu.memory_space<vmem>>, vector<4x128xf32>
    %c0_18 = arith.constant 0 : index
    %c0_19 = arith.constant 0 : index
    %11 = vector.load %arg10[%c0_18, %c0_19] : memref<4x128xf32, #tpu.memory_space<vmem>>, vector<4x128xf32>
    tpu.vector_store %arg10[%c0_18, %c0_19], %1 {strides = array<i32>} : memref<4x128xf32, #tpu.memory_space<vmem>>, vector<4x128xf32>,
    %c0_20 = arith.constant 0 : index
    %c0_21 = arith.constant 0 : index
    %12 = vector.load %arg10[%c0_20, %c0_21] : memref<4x128xf32, #tpu.memory_space<vmem>>, vector<4x16xf32>
    tpu.vector_store %arg10[%c0_20, %c0_21], %6 {strides = array<i32>} : memref<4x128xf32, #tpu.memory_space<vmem>>, vector<4x16xf32>,
    %c0_22 = arith.constant 0 : index
    %c0_23 = arith.constant 0 : index
    %13 = vector.load %arg10[%c0_22, %c0_23] : memref<4x128xf32, #tpu.memory_space<vmem>>, vector<4x128xf32>
    %c112_i32 = arith.constant 112 : i32
    %14 = tpu.dynamic_rotate %13 by %c112_i32 dim 1 : vector<4x128xf32>, i32 -> vector<4x128xf32>
    %15 = tpu.iota {dimensions = array<i32: 1>} : vector<1x128xi32>
    %c16_i32_24 = arith.constant 16 : i32
    %c0_i32 = arith.constant 0 : i32
    %16 = arith.cmpi eq, %c16_i32_24, %c0_i32 : i32
    %c1_i32 = arith.constant 1 : i32
    %17 = arith.select %16, %c1_i32, %c16_i32_24 : i32
    %18 = vector.broadcast %17 : i32 to vector<1x128xi32>
    %19 = arith.remsi %15, %18 : vector<1x128xi32>
    %c0_i32_25 = arith.constant 0 : i32
    %20 = vector.broadcast %c0_i32_25 : i32 to vector<1x128xi32>
    %21 = arith.cmpi ne, %19, %20 : vector<1x128xi32>
    %c0_i32_26 = arith.constant 0 : i32
    %22 = vector.broadcast %c0_i32_26 : i32 to vector<1x128xi32>
    %23 = arith.cmpi slt, %19, %22 : vector<1x128xi32>
    %c0_i32_27 = arith.constant 0 : i32
    %24 = arith.cmpi slt, %17, %c0_i32_27 : i32
    %25 = vector.broadcast %24 : i1 to vector<1x128xi1>
    %26 = vector.broadcast %25 : vector<1x128xi1> to vector<1x128xi1>
    %27 = arith.xori %23, %26 : vector<1x128xi1>
    %28 = arith.andi %27, %21 : vector<1x128xi1>
    %29 = vector.broadcast %17 : i32 to vector<1x128xi32>
    %30 = arith.addi %19, %29 : vector<1x128xi32>
    %31 = arith.select %28, %30, %19 : vector<1x128xi1>, vector<1x128xi32>
    %c1_i32_28 = arith.constant 1 : i32
    %32 = vector.broadcast %c1_i32_28 : i32 to vector<1x128xi32>
    %33 = arith.cmpi sge, %31, %32 : vector<1x128xi32>
    %c14_i32 = arith.constant 14 : i32
    %34 = vector.broadcast %c14_i32 : i32 to vector<1x128xi32>
    %35 = arith.cmpi sle, %31, %34 : vector<1x128xi32>
    %cst = arith.constant 0.000000e+00 : f32
    %36 = vector.broadcast %cst : f32 to vector<4x128xf32>
    %c1_i32_29 = arith.constant 1 : i32
    %37 = tpu.dynamic_rotate %10 by %c1_i32_29 dim 1 : vector<4x128xf32>, i32 -> vector<4x128xf32>
    %c0_i32_30 = arith.constant 0 : i32
    %38 = arith.sitofp %c0_i32_30 : i32 to f32
    %39 = vector.shape_cast %33 : vector<1x128xi1> to vector<1x128xi1>
    %40 = vector.broadcast %39 : vector<1x128xi1> to vector<4x128xi1>
    %41 = vector.broadcast %38 : f32 to vector<4x128xf32>
    %42 = arith.select %40, %37, %41 : vector<4x128xi1>, vector<4x128xf32>
    %c127_i32 = arith.constant 127 : i32
    %43 = tpu.dynamic_rotate %10 by %c127_i32 dim 1 : vector<4x128xf32>, i32 -> vector<4x128xf32>
    %c0_i32_31 = arith.constant 0 : i32
    %44 = arith.sitofp %c0_i32_31 : i32 to f32
    %45 = vector.shape_cast %35 : vector<1x128xi1> to vector<1x128xi1>
    %46 = vector.broadcast %45 : vector<1x128xi1> to vector<4x128xi1>
    %47 = vector.broadcast %44 : f32 to vector<4x128xf32>
    %48 = arith.select %46, %43, %47 : vector<4x128xi1>, vector<4x128xf32>
    %49 = vector.extract_strided_slice %2 {offsets = [0, 0], sizes = [4, 1], strides = [1, 1]} : vector<4x9xf32> to vector<4x1xf32>
    %50 = vector.broadcast %49 : vector<4x1xf32> to vector<4x128xf32>
    %51 = arith.mulf %42, %50 : vector<4x128xf32>
    %52 = arith.addf %36, %51 : vector<4x128xf32>
    %53 = vector.extract_strided_slice %2 {offsets = [0, 1], sizes = [4, 1], strides = [1, 1]} : vector<4x9xf32> to vector<4x1xf32>
    %54 = vector.broadcast %53 : vector<4x1xf32> to vector<4x128xf32>
    %55 = arith.mulf %10, %54 : vector<4x128xf32>
    %56 = arith.addf %52, %55 : vector<4x128xf32>
    %57 = vector.extract_strided_slice %2 {offsets = [0, 2], sizes = [4, 1], strides = [1, 1]} : vector<4x9xf32> to vector<4x1xf32>
    %58 = vector.broadcast %57 : vector<4x1xf32> to vector<4x128xf32>
    %59 = arith.mulf %48, %58 : vector<4x128xf32>
    %60 = arith.addf %56, %59 : vector<4x128xf32>
    %c1_i32_32 = arith.constant 1 : i32
    %61 = tpu.dynamic_rotate %1 by %c1_i32_32 dim 1 : vector<4x128xf32>, i32 -> vector<4x128xf32>
    %c0_i32_33 = arith.constant 0 : i32
    %62 = arith.sitofp %c0_i32_33 : i32 to f32
    %63 = vector.shape_cast %33 : vector<1x128xi1> to vector<1x128xi1>
    %64 = vector.broadcast %63 : vector<1x128xi1> to vector<4x128xi1>
    %65 = vector.broadcast %62 : f32 to vector<4x128xf32>
    %66 = arith.select %64, %61, %65 : vector<4x128xi1>, vector<4x128xf32>
    %c127_i32_34 = arith.constant 127 : i32
    %67 = tpu.dynamic_rotate %1 by %c127_i32_34 dim 1 : vector<4x128xf32>, i32 -> vector<4x128xf32>
    %c0_i32_35 = arith.constant 0 : i32
    %68 = arith.sitofp %c0_i32_35 : i32 to f32
    %69 = vector.shape_cast %35 : vector<1x128xi1> to vector<1x128xi1>
    %70 = vector.broadcast %69 : vector<1x128xi1> to vector<4x128xi1>
    %71 = vector.broadcast %68 : f32 to vector<4x128xf32>
    %72 = arith.select %70, %67, %71 : vector<4x128xi1>, vector<4x128xf32>
    %73 = vector.extract_strided_slice %2 {offsets = [0, 3], sizes = [4, 1], strides = [1, 1]} : vector<4x9xf32> to vector<4x1xf32>
    %74 = vector.broadcast %73 : vector<4x1xf32> to vector<4x128xf32>
    %75 = arith.mulf %66, %74 : vector<4x128xf32>
    %76 = arith.addf %60, %75 : vector<4x128xf32>
    %77 = vector.extract_strided_slice %2 {offsets = [0, 4], sizes = [4, 1], strides = [1, 1]} : vector<4x9xf32> to vector<4x1xf32>
    %78 = vector.broadcast %77 : vector<4x1xf32> to vector<4x128xf32>
    %79 = arith.mulf %1, %78 : vector<4x128xf32>
    %80 = arith.addf %76, %79 : vector<4x128xf32>
    %81 = vector.extract_strided_slice %2 {offsets = [0, 5], sizes = [4, 1], strides = [1, 1]} : vector<4x9xf32> to vector<4x1xf32>
    %82 = vector.broadcast %81 : vector<4x1xf32> to vector<4x128xf32>
    %83 = arith.mulf %72, %82 : vector<4x128xf32>
    %84 = arith.addf %80, %83 : vector<4x128xf32>
    %c1_i32_36 = arith.constant 1 : i32
    %85 = tpu.dynamic_rotate %14 by %c1_i32_36 dim 1 : vector<4x128xf32>, i32 -> vector<4x128xf32>
    %c0_i32_37 = arith.constant 0 : i32
    %86 = arith.sitofp %c0_i32_37 : i32 to f32
    %87 = vector.shape_cast %33 : vector<1x128xi1> to vector<1x128xi1>
    %88 = vector.broadcast %87 : vector<1x128xi1> to vector<4x128xi1>
    %89 = vector.broadcast %86 : f32 to vector<4x128xf32>
    %90 = arith.select %88, %85, %89 : vector<4x128xi1>, vector<4x128xf32>
    %c127_i32_38 = arith.constant 127 : i32
    %91 = tpu.dynamic_rotate %14 by %c127_i32_38 dim 1 : vector<4x128xf32>, i32 -> vector<4x128xf32>
    %c0_i32_39 = arith.constant 0 : i32
    %92 = arith.sitofp %c0_i32_39 : i32 to f32
    %93 = vector.shape_cast %35 : vector<1x128xi1> to vector<1x128xi1>
    %94 = vector.broadcast %93 : vector<1x128xi1> to vector<4x128xi1>
    %95 = vector.broadcast %92 : f32 to vector<4x128xf32>
    %96 = arith.select %94, %91, %95 : vector<4x128xi1>, vector<4x128xf32>
    %97 = vector.extract_strided_slice %2 {offsets = [0, 6], sizes = [4, 1], strides = [1, 1]} : vector<4x9xf32> to vector<4x1xf32>
    %98 = vector.broadcast %97 : vector<4x1xf32> to vector<4x128xf32>
    %99 = arith.mulf %90, %98 : vector<4x128xf32>
    %100 = arith.addf %84, %99 : vector<4x128xf32>
    %101 = vector.extract_strided_slice %2 {offsets = [0, 7], sizes = [4, 1], strides = [1, 1]} : vector<4x9xf32> to vector<4x1xf32>
    %102 = vector.broadcast %101 : vector<4x1xf32> to vector<4x128xf32>
    %103 = arith.mulf %14, %102 : vector<4x128xf32>
    %104 = arith.addf %100, %103 : vector<4x128xf32>
    %105 = vector.extract_strided_slice %2 {offsets = [0, 8], sizes = [4, 1], strides = [1, 1]} : vector<4x9xf32> to vector<4x1xf32>
    %106 = vector.broadcast %105 : vector<4x1xf32> to vector<4x128xf32>
    %107 = arith.mulf %96, %106 : vector<4x128xf32>
    %108 = arith.addf %104, %107 : vector<4x128xf32>
    %c0_40 = arith.constant 0 : index
    %c0_41 = arith.constant 0 : index
    %109 = vector.load %arg6[%c0_40, %c0_41] : memref<8x4xf32, #tpu.memory_space<vmem>>, vector<8x4xf32>
    %cst_42 = arith.constant dense<0.000000e+00> : vector<8x128xf32>
    %110 = tpu.matmul %109, %108, %cst_42 {dimension_numbers = #tpu.dot_dimension_numbers<[1], [0], [0], [1], [0, 0, 1, 1], [], []>} : vector<8x4xf32>, vector<4x128xf32>, vector<8x128xf32> -> vector<8x128xf32>
    %c0_43 = arith.constant 0 : index
    %c0_44 = arith.constant 0 : index
    %111 = vector.load %arg7[%c0_43, %c0_44] : memref<8x1xf32, #tpu.memory_space<vmem>>, vector<8x1xf32>
    %112 = vector.broadcast %111 : vector<8x1xf32> to vector<8x128xf32>
    %113 = arith.addf %110, %112 : vector<8x128xf32>
    %c0_45 = arith.constant 0 : index
    %c0_46 = arith.constant 0 : index
    %c0_47 = arith.constant 0 : index
    %114 = vector.load %arg8[%c0_45, %c0_46, %c0_47] : memref<1x8x128xf32, #tpu.memory_space<vmem>>, vector<1x8x128xf32>
    %115 = vector.shape_cast %114 : vector<1x8x128xf32> to vector<8x128xf32>
    %116 = vector.shape_cast %113 : vector<8x128xf32> to vector<1x8x128xf32>
    tpu.vector_store %arg8[%c0_45, %c0_46, %c0_47], %116 {strides = array<i32>} : memref<1x8x128xf32, #tpu.memory_space<vmem>>, vector<1x8x128xf32>,
    return
  }
  func.func @transform_0(%arg0: i32, %arg1: i32) -> (i32, i32, i32) {
    %c0_i32 = arith.constant 0 : i32
    %c0_i32_0 = arith.constant 0 : i32
    return %arg0, %c0_i32, %arg1 : i32, i32, i32
  }
  func.func @transform_1(%arg0: i32, %arg1: i32) -> (i32, i32, i32, i32) {
    %c0_i32 = arith.constant 0 : i32
    %c0_i32_0 = arith.constant 0 : i32
    %c0_i32_1 = arith.constant 0 : i32
    return %arg0, %arg1, %c0_i32, %c0_i32_0 : i32, i32, i32, i32
  }
  func.func @transform_2(%arg0: i32, %arg1: i32) -> (i32, i32, i32, i32) {
    %c0_i32 = arith.constant 0 : i32
    %c0_i32_0 = arith.constant 0 : i32
    %c0_i32_1 = arith.constant 0 : i32
    return %arg0, %arg1, %c0_i32, %c0_i32_0 : i32, i32, i32, i32
  }
  func.func @transform_3(%arg0: i32, %arg1: i32) -> (i32, i32) {
    %c0_i32 = arith.constant 0 : i32
    %c0_i32_0 = arith.constant 0 : i32
    %c0_i32_1 = arith.constant 0 : i32
    return %c0_i32, %c0_i32_0 : i32, i32
  }
  func.func @transform_4(%arg0: i32, %arg1: i32) -> (i32, i32) {
    %c0_i32 = arith.constant 0 : i32
    %c0_i32_0 = arith.constant 0 : i32
    %c0_i32_1 = arith.constant 0 : i32
    return %c0_i32, %c0_i32_0 : i32, i32
  }
  func.func @transform_5(%arg0: i32, %arg1: i32) -> (i32, i32) {
    %c0_i32 = arith.constant 0 : i32
    %c0_i32_0 = arith.constant 0 : i32
    %c0_i32_1 = arith.constant 0 : i32
    return %c0_i32, %c0_i32_0 : i32, i32
  }
  func.func @transform_6(%arg0: i32, %arg1: i32) -> (i32, i32, i32) {
    %c0_i32 = arith.constant 0 : i32
    %c0_i32_0 = arith.constant 0 : i32
    return %arg0, %c0_i32, %arg1 : i32, i32, i32
  }
}

</mosaic_0001>

<bundles_post_ra>
// kernel: tpu_custom_call.1
= control target key start
LH: loop header
LB: loop body
LE: loop exit
PB: predicated region body
PF: predicated region fallthrough
CT: control target
= control target key end

     0   :  { %s1344_s0 = inlined_call_operand.vmem [shape: f32[2,4,256], index: 0, kind: input, shape index: {}]   ;;  %s1345_s1 = inlined_call_operand.hbm [shape: f32[2,2,4,16], index: 1, kind: input, shape index: {}]   ;;  %s1346_s2 = inlined_call_operand.hbm [shape: f32[2,2,4,16], index: 2, kind: input, shape index: {}]   ;;  %s1347_s3 = inlined_call_operand.vmem [shape: f32[4,9], index: 3, kind: input, shape index: {}]   ;;  %s1348_s4 = inlined_call_operand.vmem [shape: f32[8,4], index: 4, kind: input, shape index: {}]   ;;  %s1349_s5 = inlined_call_operand.vmem [shape: f32[8,1], index: 5, kind: input, shape index: {}]   ;;  %s1350_s6 = inlined_call_operand.hbm [shape: f32[2,8,256], index: 6, kind: output, shape index: {}]  }
   0x1   :  { %1358 = sst [smem:[#allocation16_spill]] %s1345_s1 }
   0x2   :  { %11 = vsyncpa [#allocation5], 0 }
   0x3   :  { %13 = vsyncpa [#allocation5 + $0x1], 0 }
   0x4   :  { %14 = vsyncpa [#allocation8], 0 }
   0x5   :  { %16 = vsyncpa [#allocation8 + $0x1], 0 }
   0x6   :  { %17 = vsyncpa [#allocation6], 0 }
   0x7   :  { %19 = vsyncpa [#allocation6 + $0x1], 0  ;;  %s1050_s21 = smov 0   ;;  %s1052_s22 = smov 0  }
   0x8   :  { %s1054_s23 = smov 0   ;;  %s1056_s24 = smov 0  }
   0x9   :  { %s1058_s25 = smov 0   ;;  %s1060_s26 = smov 0  }
   0xa   :  { %s1062_s27 = smov 0   ;;  %s1064_s28 = smov 0  }
   0xb LB: > { %1359 = sst [smem:[#allocation13_spill]] %s991_s27  ;;  %s695_s29 = sadd.s32 4294967295, %s995_s28   ;;  %s995_s28 = sphi %s1064_s28, %s25_s28   ;;  %s991_s27 = sphi %s1062_s27, %s1383_s27   ;;  %s987_s26 = sphi %s1060_s26, %s1388_s26   ;;  %s983_s25 = sphi %s1058_s25, %s1381_s25   ;;  %s979_s24 = sphi %s1056_s24, %s1387_s24   ;;  %s975_s23 = sphi %s1054_s23, %s1386_s23   ;;  %s971_s22 = sphi %s1052_s22, %s1385_s22   ;;  %s967_s21 = sphi %s1050_s21, %s1384_s21  }
   0xc   : > { %s696_s30 = sadd.s32 4294967294, %s995_s28   ;;  %s34_s7 = sadd.s32 1, %s987_s26 }
   0xd   : > { %s37_s8 = sadd.s32 1, %s991_s27  ;;  %p35_p0 = scmp.ge.s32.totalorder %s34_s7, 2 }
   0xe   : > { %s74_s9 = sadd.s32 1, %s975_s23  ;;  %p81_p1 = scmp.ne.s32.totalorder %s975_s23, %s971_s22 }
   0xf   : > { %p82_p2 = scmp.eq.s32.totalorder %s995_s28, 0  ;;  %s1390_s7 = smov (%p35_p0, %s34_s7), 0 }
  0x10   : > { %1360 = sst [smem:[#allocation14_spill]] %s1390_s7  ;;  %s1392_s8 = smov (!%p35_p0, %s37_s8), %s991_s27 }
  0x11   : > { %s70_s10 = ssub.s32 %s987_s26, %s1390_s7  ;;  %p1103_p3 = por %p82_p2, %p81_p1 }
  0x12   : > { %p39_p4 = scmp.ge.s32.totalorder %s1392_s8, 2  ;;  %p87_p5 = scmp.ne.s32.totalorder %s971_s22, %s967_s21 }
  0x13   : > { %p88_p6 = scmp.eq.s32.totalorder %s695_s29, 0  ;;  %p204_p7 = scmp.eq.s32.totalorder %s695_s29, 3 }
  0x14   : > { %s1394_s8 = smov (%p39_p4, %s1392_s8), 0  ;;  %p210_p10 = scmp.eq.s32.totalorder %s696_s30, 3 }
  0x15   : > { %1362 = sst [smem:[#allocation15_spill]] %s1394_s8  ;;  %p1111_p8 = por %p88_p6, %p87_p5 }
  0x16   : > { %p1115_p9 = por %p204_p7, %p81_p1  ;;  %s69_s14 = ssub.s32 %s991_s27, %s1394_s8 }
  0x17   : > { %s1363_s12 = scalar_select %p1111_p8, 1, 0 }
  0x18   : > { %s1364_s13 = scalar_select %p1115_p9, 1, 0 }
  0x19   : > { %s71_s15 = sor.u32 %s70_s10, %s69_s14  ;;  %p1121_p12 = por %p210_p10, %p87_p5 }
  0x1a   : > { %p72_p11 = scmp.eq.s32.totalorder %s71_s15, 0  ;;  %p742_p13 = scmp.lt.s32.totalorder %s995_s28, 4 }
  0x1b   : > { %s1365_s16 = scalar_select %p1121_p12, 1, 0 }
  0x1c   : > { %s1127_s17 = sand.u32 1, %s975_s23   ;;  %s700_s20 = sshll.u32 %s991_s27, 1 }
  0x1d   : > { %s1130_s18 = scalar_select %p72_p11, %s975_s23, %s74_s9  }
  0x1e   : > { %s1353_s19 = sshll.u32 %s1127_s17, 2  ;;  %s1135_s29 = sadd.s32 %s987_s26, %s700_s20 }
  0x1f   : > { %s254_s30 = scalar_lea.vmem [#allocation4], %s1353_s19  ;;  %s1354_s14 = sshll.u32 %s1135_s29, 6 }
  0x20   : > { %s263_s10 = sshll.u32 %s254_s30, 4  ;;  %s1366_s1 = sld [smem:[#allocation16_spill]]  ;;  %s1140_s10 = int_to_ptr.vmem [resolvable:$true] %s263_s10 }
  0x21   : > { %p1151_p0 = pnand %p742_p13, %p1103_p3  ;;  %s251_s20 = scalar_lea.sflag [#allocation5], %s1127_s17 }
  0x23   : > { %p835_p5 = pneg %p1151_p0 }
  0x26   : > { %s1147_s7 = scalar_lea.hbm %s1366_s1, %s1354_s14  ;;  %s838_s15 = scalar_lea.hbm %s1366_s1, 256 }
  0x27   : > { %s833_s30 = scalar_lea.hbm %s1147_s7, 64  ;;  %p839_p3 = scmp.lt.u32.totalorder %s1147_s7, %s1366_s1 }
  0x28   : > { %p834_p4 = scmp.ne.s32.totalorder %s1147_s7, %s833_s30  ;;  %p840_p10 = scmp.lt.u32.totalorder %s838_s15, %s833_s30 }
  0x29   : > { %p842_p13 = scmp.lt.u32.totalorder %s833_s30, %s1147_s7 }
  0x2a   : > { %p836_p6 = pnand %p835_p5, %p834_p4  ;;  %p841_p11 = por %p840_p10, %p839_p3 }
  0x2c   : > { %p837_p7 = pneg %p836_p6  ;;  %p843_p1 = por %p842_p13, %p841_p11 }
  0x2e   : > { %p844_p2 = pnand %p843_p1, %p837_p7 }
  0x30   : > { %847 = shalt.err (!%p844_p2)
}
  0x31   : > { %s848_s27 = scalar_lea.vmem %s1140_s10, 64  ;;  %s997_s8 = smov [#allocation4]  }
  0x32   : > { %p849_p4 = scmp.ne.s32.totalorder %s1140_s10, %s848_s27  ;;  %s853_s11 = sshll.u32 %s997_s8, 4  ;;  %s854_s11 = int_to_ptr.vmem [resolvable:$false] %s853_s11 }
  0x33   : > { %s855_s19 = scalar_lea.vmem %s854_s11, 128  ;;  %p856_p9 = scmp.lt.s32.totalorder %s1140_s10, %s854_s11 }
  0x34   : > { %p851_p6 = pnand %p849_p4, %p835_p5  ;;  %p857_p3 = scmp.lt.s32.totalorder %s855_s19, %s848_s27 }
  0x36   : > { %p852_p12 = pneg %p851_p6  ;;  %p858_p10 = por %p857_p3, %p856_p9 }
  0x38   : > { %p859_p11 = pnand %p858_p10, %p852_p12 }
  0x3a   : > { %862 = shalt.err (!%p859_p11)
}
  0x3b   : > { %734 = dma.hbm_to_vmem [thread:$0]  (!%p1151_p0), %s1147_s7, 64, %s1140_s10, %s251_s20  }
  0x3c   : > { %p1368_p1 = scmp.lt.s32.totalorder %s995_s28, 5  ;;  %p1369_p2 = scmp.ge.s32.totalorder %s995_s28, 1 }
  0x3d   : > { %s1371_s27 = sshll.u32 %s1135_s29, 6  ;;  %s1372_s11 = sshll.u32 %s1127_s17, 2 }
  0x3e   : > { %p1187_p7 = pnand %p1369_p2, %p1368_p1  ;;  %s1196_s8 = scalar_lea.hbm %s1346_s2, %s1371_s27 }
  0x3f   : > { %s274_s19 = scalar_lea.vmem [#allocation7], %s1372_s11  ;;  %s271_s7 = scalar_lea.sflag [#allocation8], %s1127_s17 }
  0x40   : > { %s1370_s14 = scalar_select %p1187_p7, 1, 0 }
  0x41   : > { %s283_s1 = sshll.u32 %s274_s19, 4  ;;  %s863_s10 = scalar_lea.hbm %s1196_s8, 64  ;;  %s284_s1 = int_to_ptr.vmem [resolvable:$true] %s283_s1 }
  0x42   : > { %p864_p9 = scmp.ne.s32.totalorder %s1196_s8, %s863_s10  ;;  %s868_s27 = scalar_lea.hbm %s1346_s2, 256 }
  0x43   : > { %p869_p4 = scmp.lt.u32.totalorder %s1196_s8, %s1346_s2  ;;  %p870_p6 = scmp.lt.u32.totalorder %s868_s27, %s863_s10 }
  0x44   : > { %p866_p12 = pnand %p864_p9, %p835_p5  ;;  %p872_p10 = scmp.lt.u32.totalorder %s863_s10, %s1196_s8 }
  0x45   : > { %p871_p3 = por %p870_p6, %p869_p4 }
  0x46   : > { %p867_p13 = pneg %p866_p12 }
  0x47   : > { %p873_p11 = por %p872_p10, %p871_p3 }
  0x49   : > { %p874_p1 = pnand %p873_p11, %p867_p13 }
  0x4b   : > { %877 = shalt.err (!%p874_p1)
}
  0x4c   : > { %s878_s17 = scalar_lea.vmem %s284_s1, 64  ;;  %s998_s11 = smov [#allocation7]  }
  0x4d   : > { %p879_p2 = scmp.ne.s32.totalorder %s284_s1, %s878_s17  ;;  %s883_s19 = sshll.u32 %s998_s11, 4  ;;  %s884_s19 = int_to_ptr.vmem [resolvable:$false] %s883_s19 }
  0x4e   : > { %s885_s29 = scalar_lea.vmem %s884_s19, 128  ;;  %p886_p8 = scmp.lt.s32.totalorder %s284_s1, %s884_s19 }
  0x4f   : > { %p881_p9 = pnand %p879_p2, %p835_p5  ;;  %p887_p7 = scmp.lt.s32.totalorder %s885_s29, %s878_s17 }
  0x51   : > { %p882_p12 = pneg %p881_p9  ;;  %p888_p4 = por %p887_p7, %p886_p8 }
  0x53   : > { %p889_p6 = pnand %p888_p4, %p882_p12 }
  0x55   : > { %892 = shalt.err (!%p889_p6)
}
  0x56   : > { %737 = dma.hbm_to_vmem [thread:$0]  (!%p1151_p0), %s1196_s8, 64, %s284_s1, %s271_s7  }
  0x57   : > { %p1373_p13 = scmp.ne.s32.totalorder %s1370_s14, 0 }
  0x58   : > { %s1223_s10 = sand.u32 (!%p1373_p13), 1, %s971_s22   ;;  %p1374_p8 = scmp.ne.s32.totalorder (!%p1373_p13), %s1363_s12, 0 }
  0x59   : > { %292 = sbr.rel (%p1373_p13) target bundleno = 610 (0x262), region = 44  ;;  %s706_s20 = sshll.u32 (!%p1373_p13), %s1223_s10, 2 }
  0x5a   : > { %s295_s27 = scalar_lea.sflag (!%p1373_p13), [#allocation5], %s1223_s10  ;;  %s1227_s30 = scalar_lea.vmem (!%p1373_p13), [#allocation4], %s706_s20 }
  0x60   : > { %954 = dma.done.wait (%p1374_p8), %s295_s27, 64  }
  0x61   : > { %956 = vsyncadd (%p1374_p8), %s295_s27, 4294967232  ;;  %s304_s1 = scalar_lea.sflag [#allocation8], %s1223_s10  ;;  %s307_s9 = scalar_lea.vmem [#allocation7], %s706_s20 }
  0x62   : > { %958 = dma.done.wait (%p1374_p8), %s304_s1, 64  }
  0x63   : > { %960 = vsyncadd (%p1374_p8), %s304_s1, 4294967232  ;;  %p349_p0 = scmp.lt.s32.totalorder %s983_s25, 1  ;;  %p351_p5 = scmp.lt.s32.totalorder %s979_s24, 1  ;;  %v999_v0 = vmov 2   ;;  %v1000_v1 = vmov 0   ;;  %vm364_vm0 = vcmask 125952   ;;  %v372_v23 = vlaneseq }
  0x64   : > { %825 = vset.pattern.permute.xlu0 %v999_v0  ;;  %823 = vset.pattern.permute.xlu1 %v1000_v1  ;;  %v360_v2 = vld [vmem:[%s307_s9] sm:$0xf]  ;;  %v358_v3 = vld [vmem:[%s1347_s3] sm:$0xf]  ;;  %s1001_s27 = smov 16   ;;  %v1002_v5 = vmov 1  }
  0x65   : > { %s350_s14 = scalar_select %p349_p0, %s983_s25, 1  ;;  %400 = vperm.xlu1 %823, %v358_v3   ;;  %v1003_v7 = vmov 3   ;;  %v1005_v8 = vmov 5   ;;  %v1006_v9 = vmov 4   ;;  %v1007_v10 = vmov 6   ;;  %v466_v18 = vld [vmem:[%s1349_s5] sm:$0xff] }
  0x66   : > { %s352_s8 = scalar_select %p351_p5, %s979_s24, 1  ;;  %v1009_v11 = vmov 7   ;;  %v1010_v12 = vmov 8   ;;  %v359_v13 = vld [vmem:[%s1227_s30] sm:$0xf]  ;;  %v1012_v17 = vmov 0.0  }
  0x67   : > { %s709_s7 = sshll.u32 %s350_s14, 1  ;;  %s1004_s1 = smov 112   ;;  %720 = vmatprep.subr.mxu0 %v1012_v17  ;;  %vm1013_vm1 = vmmov 0   ;;  %v373_v26 = vand.u32 127, %v372_v23  ;;  %vm476_vm4 = vcmask 1043456   ;;  %v465_v62 = vld [vmem:[%s1348_s4] sm:$0xff] }
  0x68   : > { %s354_s15 = sadd.s32 %s709_s7, %s352_s8  ;;  %s1008_s9 = smov 1   ;;  %722 = vmatprep.mubr.msk.f32.mxu0 %vm1013_vm1, %v1012_v17  ;;  %vm472_vm5 = vcmask 31744  }
  0x69   : > { %s710_s17 = sshll.u32 %s354_s15, 2  ;;  %824 = vset.pattern.permute.xlu1 %v1002_v5  ;;  %s1011_s14 = smov 127   ;;  %v378_v28 = vand.u32 15, %v373_v26 }
  0x6a   : > { %s356_s12 = scalar_lea.vmem %s1344_s0, %s710_s17  ;;  %406 = vperm.xlu1 %824, %v358_v3   ;;  %s708_s17 = sshll.u32 %s1223_s10, 3 }
  0x6b   : > { %v1248_v4 = vld [vmem:[%s356_s12] sm:$0xf]  ;;  %vm1260_vm2 = vcmp.ge.s32.totalorder %v378_v28, 1  ;;  %vm1266_vm3 = vcmp.le.s32.totalorder %v378_v28, 14  ;;  %s714_s11 = sshll.u32 %s983_s25, 1  ;;  %s348_s29 = scalar_lea.vmem [#allocation9], %s708_s17 }
  0x6c   : > { %361 = vrot.lane.b32.xlu0 %v1248_v4, %s1001_s27  ;;  %367 = vst [vmem:[#allocation3] sm:$0xf] %v1248_v4  ;;  %s563_s19 = sadd.s32 %s979_s24, %s714_s11  ;;  %s567_s20 = sshll.u32 %s348_s29, 4  ;;  %s1292_s20 = int_to_ptr.vmem [resolvable:$true] %s567_s20 }
  0x6d   : > { %368 = vst.msk [vmem:[#allocation3] sm:$0xf] %vm364_vm0, %v360_v2  ;;  %s715_s12 = sshll.u32 %s563_s19, 7  ;;  %s552_s25 = scalar_lea.sflag [#allocation6], %s1223_s10 }
  0x6e   : > { %826 = vset.pattern.permute.xlu1 %v1003_v7  ;;  %s893_s24 = scalar_lea.vmem %s1292_s20, 128  ;;  %p1379_p3 = scmp.ne.s32.totalorder %s1364_s13, 0 }
  0x6f   : > { %424 = vperm.xlu1 %826, %v358_v3   ;;  %p894_p7 = scmp.ne.s32.totalorder %s1292_s20, %s893_s24 }
  0x71   : > { %p895_p10 = pnand %p894_p7, %p1379_p3 }
  0x73   : > { %828 = vset.pattern.permute.xlu1 %v1005_v8  ;;  %p896_p11 = pneg %p895_p10 }
  0x74   : > { %v369_v6 = vld [vmem:[#allocation3] sm:$0xf]  ;;  %436 = vperm.xlu1 %828, %v358_v3  }
  0x75   : > { %370 = vrot.lane.b32.xlu0 %v369_v6, %s1004_s1 }
  0x78   : > { %829 = vset.pattern.permute.xlu1 %v1007_v10 }
  0x79   : > { %412 = vperm.xlu0 %825, %v358_v3   ;;  %448 = vperm.xlu1 %829, %v358_v3  }
  0x7d   : > { %827 = vset.pattern.permute.xlu0 %v1006_v9  ;;  %831 = vset.pattern.permute.xlu1 %v1010_v12 }
  0x7e   : > { %430 = vperm.xlu0 %827, %v358_v3  }
  0x82   : > { %417 = vrot.lane.b32.xlu0 %v1248_v4, %s1008_s9 }
  0x83   : > { %830 = vset.pattern.permute.xlu0 %v1009_v11 }
  0x86   : > { %454 = vperm.xlu0 %830, %v358_v3  }
  0x8a   : > { %832 = vset.pattern.permute.xlu0 %v1000_v1 }
  0xde   : > { %v362_v14 = vpop.permute.xlu0 %361 }
  0xdf   : > { %363 = vst [vmem:[#allocation2] sm:$0xf] %v362_v14 }
  0xe0   : > { %365 = vst.msk [vmem:[#allocation2] sm:$0xf] %vm364_vm0, %v359_v13 }
  0xe4   : > { %v401_v19 = vpop.permute.xlu1 %400 }
  0xe7   : > { %v366_v15 = vld [vmem:[#allocation2] sm:$0xf]  ;;  %v371_v16 = vpop.permute.xlu0 %370 }
  0xe8   : > { %388 = vrot.lane.b32.xlu1 %v366_v15, %s1008_s9  ;;  %441 = vrot.lane.b32.xlu0 %v371_v16, %s1008_s9  ;;  %s1290_s9 = scalar_lea.hbm %s1350_s6, %s715_s12 }
  0xe9   : > { %v407_v20 = vpop.permute.xlu1 %406 }
  0xea   : > { %v409_v36 = vmul.f32 %v407_v20, %v366_v15 }
  0xec   : > { %393 = vrot.lane.b32.xlu1 %v366_v15, %s1011_s14  ;;  %469 = vperm.xlu0 %832, %v466_v18  }
  0xee   : > { %v425_v21 = vpop.permute.xlu1 %424 }
  0xf0   : > { %420 = vrot.lane.b32.xlu1 %v1248_v4, %s1011_s14 }
  0xf3   : > { %v437_v24 = vpop.permute.xlu1 %436 }
  0xf4   : > { %460 = vperm.xlu1 %831, %v358_v3  }
  0xf8   : > { %444 = vrot.lane.b32.xlu1 %v371_v16, %s1011_s14  ;;  %v413_v22 = vpop.permute.xlu0 %412  ;;  %v449_v27 = vpop.permute.xlu1 %448  ;;  %s1014_s14 = smov [#allocation9]  }
  0xf9   : > { %s897_s8 = sshll.u32 %s1014_s14, 4  ;;  %s898_s8 = int_to_ptr.vmem [resolvable:$false] %s897_s8 }
  0xfa   : > { %s899_s30 = scalar_lea.vmem %s898_s8, 256  ;;  %p900_p1 = scmp.lt.s32.totalorder %s1292_s20, %s898_s8 }
  0xfb   : > { %p901_p2 = scmp.lt.s32.totalorder %s899_s30, %s893_s24 }
  0xfd   : > { %v431_v25 = vpop.permute.xlu0 %430  ;;  %p902_p9 = por %p901_p2, %p900_p1 }
  0xfe   : > { %v433_v42 = vmul.f32 %v431_v25, %v1248_v4 }
  0xff   : > { %p903_p12 = pnand %p902_p9, %p896_p11 }
 0x101   : > { %v418_v29 = vpop.permute.xlu0 %417 }
 0x102   : > { %v419_v38 = vsel %vm1260_vm2, %v418_v29, 0.0 }
 0x103   : > { %v427_v43 = vmul.f32 %v425_v21, %v419_v38 }
 0x105   : > { %v455_v35 = vpop.permute.xlu0 %454 }
 0x106   : > { %v457_v54 = vmul.f32 %v455_v35, %v371_v16 }
 0x15a   : > { %v389_v31 = vpop.permute.xlu1 %388  ;;  %v442_v46 = vpop.permute.xlu0 %441 }
 0x15b   : > { %v392_v32 = vsel %vm1260_vm2, %v389_v31, 0.0  ;;  %v443_v49 = vsel %vm1260_vm2, %v442_v46, 0.0 }
 0x15c   : > { %v403_v33 = vmul.f32 %v401_v19, %v392_v32  ;;  %v451_v53 = vmul.f32 %v449_v27, %v443_v49 }
 0x15e   : > { %v394_v37 = vpop.permute.xlu1 %393  ;;  %v410_v40 = vadd.f32 %v409_v36, %v403_v33 }
 0x15f   : > { %v397_v39 = vsel %vm1266_vm3, %v394_v37, 0.0 }
 0x160   : > { %v415_v41 = vmul.f32 %v413_v22, %v397_v39 }
 0x162   : > { %v416_v44 = vadd.f32 %v415_v41, %v410_v40  ;;  %v421_v45 = vpop.permute.xlu1 %420 }
 0x163   : > { %v422_v47 = vsel %vm1266_vm3, %v421_v45, 0.0 }
 0x164   : > { %v428_v48 = vadd.f32 %v427_v43, %v416_v44  ;;  %v439_v51 = vmul.f32 %v437_v24, %v422_v47 }
 0x166   : > { %v434_v50 = vadd.f32 %v433_v42, %v428_v48 }
 0x168   : > { %v440_v52 = vadd.f32 %v439_v51, %v434_v50 }
 0x16a   : > { %v452_v55 = vadd.f32 %v451_v53, %v440_v52 }
 0x16b   : > { %v470_v63 = vpop.permute.xlu0 %469 }
 0x16c   : > { %v458_v56 = vadd.f32 %v457_v54, %v452_v55 }
 0x173   : > { %v461_v57 = vpop.permute.xlu1 %460 }
 0x177   : > { %v445_v58 = vpop.permute.xlu1 %444 }
 0x178   : > { %v446_v59 = vsel %vm1266_vm3, %v445_v58, 0.0 }
 0x179   : > { %v463_v60 = vmul.f32 %v461_v57, %v446_v59 }
 0x17b   : > { %v464_v61 = vadd.f32 %v463_v60, %v458_v56 }
 0x17d   : > { %721 = vmatpush3.msk.msra.mxu0 %vm476_vm4, %v464_v61 }
 0x17e   : > { %723 = vmatmul.mubr.msk.f32.vlgmr.msra.gmra.mrb[0].mxu0 %vm472_vm5, %v465_v62 }
 0x251   : > { %v546_v0 = vpop.f32.mrb[0].mxu0 }
 0x252   : > { %v547_v1 = vadd.f32 %v546_v0, %v470_v63  ;;  %v724_v2 = vpop.f32.mrb[1].mxu0 }
 0x254   : > { %550 = vst [vmem:[%s348_s29] sm:$0xff] %v547_v1 }
 0x255   : > { %906 = shalt.err (!%p903_p12)
}
 0x256   : > { %s907_s10 = scalar_lea.hbm %s1290_s9, 128  ;;  %s911_s17 = scalar_lea.hbm %s1350_s6, 512 }
 0x257   : > { %p908_p4 = scmp.ne.s32.totalorder %s1290_s9, %s907_s10  ;;  %p912_p8 = scmp.lt.u32.totalorder %s1290_s9, %s1350_s6 }
 0x258   : > { %p913_p0 = scmp.lt.u32.totalorder %s911_s17, %s907_s10  ;;  %p915_p7 = scmp.lt.u32.totalorder %s907_s10, %s1290_s9 }
 0x259   : > { %p909_p6 = pnand %p908_p4, %p1379_p3 }
 0x25a   : > { %p914_p5 = por %p913_p0, %p912_p8 }
 0x25b   : > { %p910_p13 = pneg %p909_p6 }
 0x25c   : > { %p916_p10 = por %p915_p7, %p914_p5 }
 0x25e   : > { %p917_p11 = pnand %p916_p10, %p910_p13 }
 0x260   : > { %920 = shalt.err (!%p917_p11)
}
 0x261   : > { %729 = dma.vmem_to_hbm [thread:$0]  (%p1379_p3), %s1292_s20, 128, %s1290_s9, %s552_s25  }
 0x262 PF: > { %p743_p1 = scmp.ge.s32.totalorder %s995_s28, 2  ;;  %s579_s12 = sand.u32 1, %s967_s21  }
 0x263   : > { %p1380_p2 = scmp.ne.s32.totalorder %s1365_s16, 0  ;;  %s580_s29 = scalar_lea.sflag [#allocation6], %s579_s12 }
 0x265   : > { %p739_p9 = pnand %p743_p1, %p1380_p2 }
 0x267   : > { %962 = dma.done.wait (!%p739_p9), %s580_s29, 128  }
 0x268   : > { %964 = vsyncadd (!%p739_p9), %s580_s29, 4294967168  ;;  %s25_s28 = sadd.s32 1, %s995_s28   ;;  %s1381_s25 = sld [smem:[#allocation13_spill]] }
 0x269   : > { %p22_p12 = scmp.ge.s32.totalorder %s25_s28, 6   ;;  %s1382_s13 = sld [smem:[#allocation14_spill]] }
 0x26a   : > { %s1383_s27 = sld [smem:[#allocation15_spill]]  ;;  %s1384_s21 = smov %s971_s22 }
 0x26b   : > { %s1385_s22 = smov %s975_s23  ;;  %s1386_s23 = smov %s1130_s18 }
 0x26c   : > { %s1387_s24 = smov %s987_s26  ;;  %24 = sbr.rel (!%p22_p12) target bundleno = 11 (0xb), region = 105 }
 0x26f   : > { %s1388_s26 = smov %s1382_s13 }
 0x273   :  { %585 = vsyncpa [#allocation5], 1 }
 0x274   :  { %587 = vsyncpa [#allocation5 + $0x1], 1 }
 0x275   :  { %588 = vsyncpa [#allocation8], 1 }
 0x276   :  { %590 = vsyncpa [#allocation8 + $0x1], 1 }
 0x277   :  { %591 = vsyncpa [#allocation6], 1 }
 0x278   :  { %593 = vsyncpa [#allocation6 + $0x1], 1 }

</bundles_post_ra>
